<compile_context>
chip_gen: v7x
topology: tpu7x:2x2x1
jax: 0.10.0
libtpu: 0.0.40
codegen_flags: <defaults>
</compile_context>

<pallas_src>
import math

import jax
import jax.numpy as jnp
from jax.experimental import pallas as pl
from jax.experimental.pallas import tpu as pltpu

BN_EPS = 1e-5


# ----------------------------------------------------------------------------
# Kernel: x tile arrives as (tile_b, F); activations are (H, tile_b) so batch
# stays on the lane axis and the final store is a lane-dense (1, tile_b) slab.
# ----------------------------------------------------------------------------
def rscore_kernel(x_ref, w1_ref, w2_ref, w3_ref, w4_ref, bias_ref, o_ref):
    b = bias_ref[...]                   # (H, 4): cols 0..2 = folded b1..b3, [0,3] = b4

    # W1[h,f] . x[b,f] -> h[h,b]: contraction on the shared feature axis, same
    # pattern as q @ k^T in flash attention.  No HBM transpose of x needed.
    h = jax.lax.dot_general(
        w1_ref[...], x_ref[...],
        dimension_numbers=(((1,), (1,)), ((), ())),
        preferred_element_type=jnp.float32) + b[:, 0:1]
    h = jnp.maximum(h, 0.0)
    h = jnp.dot(w2_ref[...], h, preferred_element_type=jnp.float32) + b[:, 1:2]
    h = jnp.maximum(h, 0.0)
    h = jnp.dot(w3_ref[...], h, preferred_element_type=jnp.float32) + b[:, 2:3]
    h = jnp.maximum(h, 0.0)
    logits = jnp.dot(w4_ref[...], h, preferred_element_type=jnp.float32) + b[0:1, 3:4]
    o_ref[...] = jax.nn.sigmoid(logits)  # (1, tile_b), lane-dense store


# ----------------------------------------------------------------------------
# Parameters (PyTorch-style layout and default init).
# ----------------------------------------------------------------------------
def init_params(key, input_size, hidden_size):
    """Linear: W (out, in), b (out,), U(-1/sqrt(fan_in), 1/sqrt(fan_in)).
    BatchNorm1d: gamma=1, beta=0, running_mean=0, running_var=1."""
    def linear(k, fan_in, fan_out):
        kw, kb = jax.random.split(k)
        bound = 1.0 / math.sqrt(fan_in)
        W = jax.random.uniform(kw, (fan_out, fan_in), jnp.float32, -bound, bound)
        b = jax.random.uniform(kb, (fan_out,), jnp.float32, -bound, bound)
        return W, b

    def bn(h):
        return (jnp.ones((h,), jnp.float32), jnp.zeros((h,), jnp.float32),
                jnp.zeros((h,), jnp.float32), jnp.ones((h,), jnp.float32))

    k1, k2, k3, k4 = jax.random.split(key, 4)
    p = {}
    p["W1"], p["b1"] = linear(k1, input_size, hidden_size)
    p["W2"], p["b2"] = linear(k2, hidden_size, hidden_size)
    p["W3"], p["b3"] = linear(k3, hidden_size, hidden_size)
    p["W4"], p["b4"] = linear(k4, hidden_size, 1)
    p["bn1"] = bn(hidden_size)
    p["bn2"] = bn(hidden_size)
    p["bn3"] = bn(hidden_size)
    return p


def _fold_bn(W, b, gamma, beta, rm, rv):
    """Fold eval-mode BatchNorm into the preceding Linear.
    y = (Wx + b - rm) * scale + beta,  scale = gamma * rsqrt(rv + eps)."""
    scale = gamma * jax.lax.rsqrt(rv + BN_EPS)
    return W * scale[:, None], (b - rm) * scale + beta


def _pick_tile_b(B, tile_b):
    """128-aligned batch tile, large enough to amortize the ~0.35us per-step
    overhead but capped near ceil(B/4) so mid-sized batches still give >=4
    grid steps (keeps both v7x TensorCores busy on the 'parallel' axis)."""
    tile_b = max(128, (int(tile_b) // 128) * 128)
    cap = max(128, pl.cdiv(B, 4 * 128) * 128)   # ~ceil(B/4), 128-aligned
    return min(tile_b, cap)


# ----------------------------------------------------------------------------
# Wrapper: fold BN, tile batch with a 1-D grid, no HBM transpose of x.
# ----------------------------------------------------------------------------
def rscore_predictor_forward(x, params, tile_b=16384):
    """x: (batch, input_size) float32 -> (batch, 1) float32 in (0, 1)."""
    B, F = x.shape
    H = params["W1"].shape[0]

    # Fold BatchNorm into the linear layers (wrapper-side, once).
    w1, b1 = _fold_bn(params["W1"], params["b1"], *params["bn1"])
    w2, b2 = _fold_bn(params["W2"], params["b2"], *params["bn2"])
    w3, b3 = _fold_bn(params["W3"], params["b3"], *params["bn3"])
    w4, b4 = params["W4"], params["b4"]

    # Pack all biases into a single small VMEM array (one DMA instead of four).
    bias_pack = jnp.zeros((H, 4), jnp.float32)
    bias_pack = bias_pack.at[:, 0].set(b1).at[:, 1].set(b2).at[:, 2].set(b3)
    bias_pack = bias_pack.at[0, 3].set(b4[0])

    # Batch tiling: row-pad x only when B is not a multiple of the tile
    # (keeps every block read in-bounds; padded rows are finite and discarded).
    tb = _pick_tile_b(B, tile_b)
    pb = pl.cdiv(B, tb) * tb
    xp = x if pb == B else jnp.pad(x, ((0, pb - B), (0, 0)))
    grid = (pb // tb,)

    const = lambda i: (0, 0)                  # weights/biases: resident, DMA'd once
    flops = 2 * pb * (F * H + H * H + H * H + H)
    bytes_accessed = 4 * (pb * F + pb + H * F + 2 * H * H + H + H * 4)

    out = pl.pallas_call(
        rscore_kernel,
        out_shape=jax.ShapeDtypeStruct((1, pb), jnp.float32),
        grid=grid,
        in_specs=[
            pl.BlockSpec((tb, F), lambda i: (i, 0)),       # x tile (pipelined)
            pl.BlockSpec((H, F), const),                   # W1'
            pl.BlockSpec((H, H), const),                   # W2'
            pl.BlockSpec((H, H), const),                   # W3'
            pl.BlockSpec((1, H), const),                   # W4
            pl.BlockSpec((H, 4), const),                   # packed biases
        ],
        out_specs=pl.BlockSpec((1, tb), lambda i: (0, i)),
        compiler_params=pltpu.CompilerParams(
            dimension_semantics=("parallel",),             # megacore on v7x
            vmem_limit_bytes=32 * 1024 * 1024,             # safe on v7x's 64 MiB
        ),
        cost_estimate=pl.CostEstimate(
            flops=flops, transcendentals=pb, bytes_accessed=bytes_accessed),
    )(xp, w1, w2, w3, w4, bias_pack)

    return out[:, :B].T                                    # (B, 1)


# ----------------------------------------------------------------------------
# Plain-JAX reference with identical (PyTorch eval-mode) semantics.
# ----------------------------------------------------------------------------
def reference_forward(x, p):
    def bn(z, stats):
        g, be, rm, rv = stats
        return (z - rm) * (g * jax.lax.rsqrt(rv + BN_EPS)) + be

    h = jnp.maximum(bn(x @ p["W1"].T + p["b1"], p["bn1"]), 0.0)
    h = jnp.maximum(bn(h @ p["W2"].T + p["b2"], p["bn2"]), 0.0)
    h = jnp.maximum(bn(h @ p["W3"].T + p["b3"], p["bn3"]), 0.0)
    return jax.nn.sigmoid(h @ p["W4"].T + p["b4"])


if __name__ == "__main__":
    input_size = 32
    hidden_size = 32
    batch = 8

    key = jax.random.PRNGKey(0)
    k_x, k_p = jax.random.split(key)
    x = jax.random.normal(k_x, (batch, input_size), jnp.float32)
    params = init_params(k_p, input_size, hidden_size)

    out = jax.block_until_ready(rscore_predictor_forward(x, params))
    ref = reference_forward(x, params)

    assert out.shape == (batch, 1)
    assert jnp.allclose(out, ref, atol=3e-5, rtol=1e-4), "mismatch vs reference"

    print("KERNEL_OK")
</pallas_src>

<mosaic_0001>
module attributes {stable_mosaic.version = 11 : i64} {
  func.func @rscore_kernel(%arg0: i32, %arg1: memref<128x32xf32, #tpu.memory_space<vmem>>, %arg2: memref<32x32xf32, #tpu.memory_space<vmem>>, %arg3: memref<32x32xf32, #tpu.memory_space<vmem>>, %arg4: memref<32x32xf32, #tpu.memory_space<vmem>>, %arg5: memref<1x32xf32, #tpu.memory_space<vmem>>, %arg6: memref<32x4xf32, #tpu.memory_space<vmem>>, %arg7: memref<1x128xf32, #tpu.memory_space<vmem>>) attributes {dimension_semantics = [#tpu.dimension_semantics<parallel>], iteration_bounds = array<i64: 1>, scalar_prefetch = 0 : i64, scratch_operands = 0 : i64, tpu.core_type = #tpu.core_type<tc>, window_params = [{transform_indices = @transform_0, window_bounds = array<i64: 128, 32>}, {pipeline_mode = #tpu.pipeline_mode<synchronous>, transform_indices = @transform_1, window_bounds = array<i64: 32, 32>}, {pipeline_mode = #tpu.pipeline_mode<synchronous>, transform_indices = @transform_2, window_bounds = array<i64: 32, 32>}, {pipeline_mode = #tpu.pipeline_mode<synchronous>, transform_indices = @transform_3, window_bounds = array<i64: 32, 32>}, {pipeline_mode = #tpu.pipeline_mode<synchronous>, transform_indices = @transform_4, window_bounds = array<i64: 1, 32>}, {pipeline_mode = #tpu.pipeline_mode<synchronous>, transform_indices = @transform_5, window_bounds = array<i64: 32, 4>}, {transform_indices = @transform_6, window_bounds = array<i64: 1, 128>}]} {
    %c0 = arith.constant 0 : index
    %c0_0 = arith.constant 0 : index
    %0 = vector.load %arg6[%c0, %c0_0] : memref<32x4xf32, #tpu.memory_space<vmem>>, vector<32x4xf32>
    %c0_1 = arith.constant 0 : index
    %c0_2 = arith.constant 0 : index
    %1 = vector.load %arg2[%c0_1, %c0_2] : memref<32x32xf32, #tpu.memory_space<vmem>>, vector<32x32xf32>
    %c0_3 = arith.constant 0 : index
    %c0_4 = arith.constant 0 : index
    %2 = vector.load %arg1[%c0_3, %c0_4] : memref<128x32xf32, #tpu.memory_space<vmem>>, vector<128x32xf32>
    %cst = arith.constant dense<0.000000e+00> : vector<32x128xf32>
    %3 = tpu.matmul %1, %2, %cst {dimension_numbers = #tpu.dot_dimension_numbers<[1], [1], [0], [0], [0, 0, 1, 0], [], []>} : vector<32x32xf32>, vector<128x32xf32>, vector<32x128xf32> -> vector<32x128xf32>
    %4 = vector.extract_strided_slice %0 {offsets = [0, 0], sizes = [32, 1], strides = [1, 1]} : vector<32x4xf32> to vector<32x1xf32>
    %5 = vector.broadcast %4 : vector<32x1xf32> to vector<32x128xf32>
    %6 = arith.addf %3, %5 : vector<32x128xf32>
    %cst_5 = arith.constant 0.000000e+00 : f32
    %7 = vector.broadcast %cst_5 : f32 to vector<32x128xf32>
    %8 = arith.maximumf %6, %7 : vector<32x128xf32>
    %c0_6 = arith.constant 0 : index
    %c0_7 = arith.constant 0 : index
    %9 = vector.load %arg3[%c0_6, %c0_7] : memref<32x32xf32, #tpu.memory_space<vmem>>, vector<32x32xf32>
    %cst_8 = arith.constant dense<0.000000e+00> : vector<32x128xf32>
    %10 = tpu.matmul %9, %8, %cst_8 {dimension_numbers = #tpu.dot_dimension_numbers<[1], [0], [0], [1], [0, 0, 1, 1], [], []>} : vector<32x32xf32>, vector<32x128xf32>, vector<32x128xf32> -> vector<32x128xf32>
    %11 = vector.extract_strided_slice %0 {offsets = [0, 1], sizes = [32, 1], strides = [1, 1]} : vector<32x4xf32> to vector<32x1xf32>
    %12 = vector.broadcast %11 : vector<32x1xf32> to vector<32x128xf32>
    %13 = arith.addf %10, %12 : vector<32x128xf32>
    %cst_9 = arith.constant 0.000000e+00 : f32
    %14 = vector.broadcast %cst_9 : f32 to vector<32x128xf32>
    %15 = arith.maximumf %13, %14 : vector<32x128xf32>
    %c0_10 = arith.constant 0 : index
    %c0_11 = arith.constant 0 : index
    %16 = vector.load %arg4[%c0_10, %c0_11] : memref<32x32xf32, #tpu.memory_space<vmem>>, vector<32x32xf32>
    %cst_12 = arith.constant dense<0.000000e+00> : vector<32x128xf32>
    %17 = tpu.matmul %16, %15, %cst_12 {dimension_numbers = #tpu.dot_dimension_numbers<[1], [0], [0], [1], [0, 0, 1, 1], [], []>} : vector<32x32xf32>, vector<32x128xf32>, vector<32x128xf32> -> vector<32x128xf32>
    %18 = vector.extract_strided_slice %0 {offsets = [0, 2], sizes = [32, 1], strides = [1, 1]} : vector<32x4xf32> to vector<32x1xf32>
    %19 = vector.broadcast %18 : vector<32x1xf32> to vector<32x128xf32>
    %20 = arith.addf %17, %19 : vector<32x128xf32>
    %cst_13 = arith.constant 0.000000e+00 : f32
    %21 = vector.broadcast %cst_13 : f32 to vector<32x128xf32>
    %22 = arith.maximumf %20, %21 : vector<32x128xf32>
    %c0_14 = arith.constant 0 : index
    %c0_15 = arith.constant 0 : index
    %23 = vector.load %arg5[%c0_14, %c0_15] : memref<1x32xf32, #tpu.memory_space<vmem>>, vector<1x32xf32>
    %cst_16 = arith.constant dense<0.000000e+00> : vector<1x128xf32>
    %24 = tpu.matmul %23, %22, %cst_16 {dimension_numbers = #tpu.dot_dimension_numbers<[1], [0], [0], [1], [0, 0, 1, 1], [], []>} : vector<1x32xf32>, vector<32x128xf32>, vector<1x128xf32> -> vector<1x128xf32>
    %25 = vector.extract_strided_slice %0 {offsets = [0, 3], sizes = [1, 1], strides = [1, 1]} : vector<32x4xf32> to vector<1x1xf32>
    %26 = vector.broadcast %25 : vector<1x1xf32> to vector<1x128xf32>
    %27 = arith.addf %24, %26 : vector<1x128xf32>
    %28 = arith.negf %27 : vector<1x128xf32>
    %29 = math.exp %28 : vector<1x128xf32>
    %cst_17 = arith.constant 1.000000e+00 : f32
    %30 = vector.broadcast %cst_17 : f32 to vector<1x128xf32>
    %31 = arith.addf %30, %29 : vector<1x128xf32>
    %32 = arith.divf %30, %31 : vector<1x128xf32>
    %c0_18 = arith.constant 0 : index
    %c0_19 = arith.constant 0 : index
    %33 = vector.load %arg7[%c0_18, %c0_19] : memref<1x128xf32, #tpu.memory_space<vmem>>, vector<1x128xf32>
    tpu.vector_store %arg7[%c0_18, %c0_19], %32 {strides = array<i32>} : memref<1x128xf32, #tpu.memory_space<vmem>>, vector<1x128xf32>,
    return
  }
  func.func @transform_0(%arg0: i32) -> (i32, i32) {
    %c0_i32 = arith.constant 0 : i32
    %c0_i32_0 = arith.constant 0 : i32
    return %arg0, %c0_i32 : i32, i32
  }
  func.func @transform_1(%arg0: i32) -> (i32, i32) {
    %c0_i32 = arith.constant 0 : i32
    %c0_i32_0 = arith.constant 0 : i32
    %c0_i32_1 = arith.constant 0 : i32
    return %c0_i32, %c0_i32_0 : i32, i32
  }
  func.func @transform_2(%arg0: i32) -> (i32, i32) {
    %c0_i32 = arith.constant 0 : i32
    %c0_i32_0 = arith.constant 0 : i32
    %c0_i32_1 = arith.constant 0 : i32
    return %c0_i32, %c0_i32_0 : i32, i32
  }
  func.func @transform_3(%arg0: i32) -> (i32, i32) {
    %c0_i32 = arith.constant 0 : i32
    %c0_i32_0 = arith.constant 0 : i32
    %c0_i32_1 = arith.constant 0 : i32
    return %c0_i32, %c0_i32_0 : i32, i32
  }
  func.func @transform_4(%arg0: i32) -> (i32, i32) {
    %c0_i32 = arith.constant 0 : i32
    %c0_i32_0 = arith.constant 0 : i32
    %c0_i32_1 = arith.constant 0 : i32
    return %c0_i32, %c0_i32_0 : i32, i32
  }
  func.func @transform_5(%arg0: i32) -> (i32, i32) {
    %c0_i32 = arith.constant 0 : i32
    %c0_i32_0 = arith.constant 0 : i32
    %c0_i32_1 = arith.constant 0 : i32
    return %c0_i32, %c0_i32_0 : i32, i32
  }
  func.func @transform_6(%arg0: i32) -> (i32, i32) {
    %c0_i32 = arith.constant 0 : i32
    %c0_i32_0 = arith.constant 0 : i32
    return %c0_i32, %arg0 : i32, i32
  }
}

</mosaic_0001>

<bundles_post_ra>
// kernel: tpu_custom_call.1
= control target key start
LH: loop header
LB: loop body
LE: loop exit
PB: predicated region body
PF: predicated region fallthrough
CT: control target
= control target key end

     0   :  { %vm68_vm0 = vcmask 261120   ;;  %v820_v6 = vmov 0   ;;  %s1046_s0 = inlined_call_operand.vmem [shape: f32[128,32], index: 0, kind: input, shape index: {}]   ;;  %s1047_s1 = inlined_call_operand.vmem [shape: f32[32,32], index: 1, kind: input, shape index: {}]   ;;  %s1048_s2 = inlined_call_operand.vmem [shape: f32[32,32], index: 2, kind: input, shape index: {}]   ;;  %s1049_s3 = inlined_call_operand.vmem [shape: f32[32,32], index: 3, kind: input, shape index: {}]   ;;  %s1050_s4 = inlined_call_operand.vmem [shape: f32[1,32], index: 4, kind: input, shape index: {}]   ;;  %s1051_s5 = inlined_call_operand.vmem [shape: f32[32,4], index: 5, kind: input, shape index: {}]   ;;  %s1052_s6 = inlined_call_operand.hbm [shape: f32[1,128], index: 6, kind: output, shape index: {}]  }
   0x1   :  { %v32_v0 = vld [vmem:[%s1046_s0] sm:$0xff]  ;;  %v33_v1 = vld [vmem:[%s1046_s0 + $0x8] sm:$0xff]  ;;  %v34_v2 = vld [vmem:[%s1046_s0 + $0x10] sm:$0xff]  ;;  %785 = vset.pattern.permute.xlu0 %v820_v6  ;;  %786 = vset.pattern.permute.xlu1 %v820_v6 }
   0x2   :  { %v707_v3 = vpack.c.bf16 %v33_v1, %v32_v0  ;;  %vm874_vm1 = vmpackc.low %vm68_vm0, %vm68_vm0  ;;  %v35_v5 = vld [vmem:[%s1046_s0 + $0x18] sm:$0xff]  ;;  %v28_v8 = vld [vmem:[%s1047_s1] sm:$0xff] }
   0x3   :  { %v713_v7 = vpack.c.bf16 %v35_v5, %v34_v2  ;;  %v36_v9 = vld [vmem:[%s1046_s0 + $0x20] sm:$0xff]  ;;  %v37_v10 = vld [vmem:[%s1046_s0 + $0x28] sm:$0xff]  ;;  %662 = vmatprep.mubr.msk.f32.mxu0 %vm68_vm0, %v28_v8  ;;  %v905_v12 = vld [vmem:[%s1051_s5 + $0x10] sm:$0xff] }
   0x4   :  { %709 = vmatprep.subr.msk.bf16.mxu0 %vm874_vm1, %v707_v3  ;;  %v900_v11 = vld [vmem:[%s1051_s5] sm:$0xff]  ;;  %60 = vperm.xlu1 %786, %v905_v12  }
   0x5   :  { %712 = vmatpush3.bf16.xpose.msk.msra.mxu0 %vm874_vm1, %v707_v3  ;;  %50 = vperm.xlu0 %785, %v900_v11  }
   0x6   :  { %715 = vmatprep.subr.msk.bf16.mxu0 %vm874_vm1, %v713_v7 }
   0x7   :  { %11 = vsyncpa [#allocation3], 0  ;;  %v719_v13 = vpack.c.bf16 %v37_v10, %v36_v9  ;;  %v912_v14 = vld [vmem:[%s1051_s5 + $0x8] sm:$0xff]  ;;  %v917_v15 = vld [vmem:[%s1051_s5 + $0x18] sm:$0xff]  ;;  %v821_v35 = vmov 1   ;;  %v822_v58 = vmov 2  }
   0x8   :  { %65 = vperm.xlu1 %786, %v917_v15   ;;  %v38_v16 = vld [vmem:[%s1046_s0 + $0x30] sm:$0xff]  ;;  %v39_v17 = vld [vmem:[%s1046_s0 + $0x38] sm:$0xff]  ;;  %v40_v19 = vld [vmem:[%s1046_s0 + $0x40] sm:$0xff]  ;;  %vm824_vm2 = vmmov 0   ;;  %s827_s9 = smov [#allocation2]  }
   0x9   :  { %55 = vperm.xlu0 %785, %v912_v14   ;;  %v725_v18 = vpack.c.bf16 %v39_v17, %v38_v16  ;;  %v41_v20 = vld [vmem:[%s1046_s0 + $0x48] sm:$0xff]  ;;  %v42_v22 = vld [vmem:[%s1046_s0 + $0x50] sm:$0xff]  ;;  %v43_v23 = vld [vmem:[%s1046_s0 + $0x58] sm:$0xff]  ;;  %v823_v17 = vmov 0.0|0.0   ;;  %s551_s10 = sshll.u32 %s827_s9, 4  ;;  %s552_s10 = int_to_ptr.vmem [resolvable:$true] %s551_s10 }
   0xa   :  { %v731_v21 = vpack.c.bf16 %v41_v20, %v40_v19  ;;  %v737_v24 = vpack.c.bf16 %v43_v23, %v42_v22  ;;  %v44_v25 = vld [vmem:[%s1046_s0 + $0x60] sm:$0xff]  ;;  %v45_v26 = vld [vmem:[%s1046_s0 + $0x68] sm:$0xff]  ;;  %v46_v28 = vld [vmem:[%s1046_s0 + $0x70] sm:$0xff]  ;;  %v826_v19 = vmov 3   ;;  %s796_s11 = scalar_lea.vmem %s552_s10, 16  ;;  %s800_s12 = scalar_lea.vmem %s552_s10, 32 }
   0xb   :  { %v743_v27 = vpack.c.bf16 %v45_v26, %v44_v25  ;;  %v47_v29 = vld [vmem:[%s1046_s0 + $0x78] sm:$0xff]  ;;  %v29_v31 = vld [vmem:[%s1047_s1 + $0x8] sm:$0xff]  ;;  %v30_v32 = vld [vmem:[%s1047_s1 + $0x10] sm:$0xff]  ;;  %p797_p0 = scmp.ne.s32.totalorder %s552_s10, %s796_s11  ;;  %p801_p1 = scmp.lt.s32.totalorder %s552_s10, %s552_s10 }
   0xc   :  { %v749_v30 = vpack.c.bf16 %v47_v29, %v46_v28  ;;  %v31_v33 = vld [vmem:[%s1047_s1 + $0x18] sm:$0xff]  ;;  %v218_v34 = vld [vmem:[%s1048_s2] sm:$0xff]  ;;  %788 = vset.pattern.permute.xlu1 %v821_v35  ;;  %v219_v54 = vld [vmem:[%s1048_s2 + $0x8] sm:$0xff]  ;;  %p802_p2 = scmp.lt.s32.totalorder %s800_s12, %s796_s11 }
   0xd   :  { %718 = vmatpush3.bf16.xpose.msk.msra.mxu0 %vm874_vm1, %v713_v7  ;;  %676 = vmatprep.mubr.msk.f32.mxu1 %vm68_vm0, %v218_v34  ;;  %v220_v55 = vld [vmem:[%s1048_s2 + $0x10] sm:$0xff]  ;;  %v221_v56 = vld [vmem:[%s1048_s2 + $0x18] sm:$0xff]  ;;  %v339_v57 = vld [vmem:[%s1049_s3] sm:$0xff] }
   0xe   :  { %721 = vmatprep.subr.msk.bf16.mxu0 %vm874_vm1, %v719_v13  ;;  %787 = vset.pattern.permute.xlu0 %v821_v35  ;;  %v342_v16 = vld [vmem:[%s1049_s3 + $0x18] sm:$0xff]  ;;  %p803_p3 = por %p802_p2, %p801_p1 }
   0xf   :  { %227 = vperm.xlu1 %788, %v912_v14   ;;  %223 = vperm.xlu0 %787, %v900_v11  }
  0x10   :  { %p804_p4 = pnand %p803_p3, %p797_p0 }
  0x13   :  { %231 = vperm.xlu1 %788, %v905_v12   ;;  %235 = vperm.xlu0 %787, %v917_v15  }
  0x15   :  { %724 = vmatpush3.bf16.xpose.msk.msra.mxu0 %vm874_vm1, %v719_v13 }
  0x16   :  { %727 = vmatprep.subr.msk.bf16.mxu0 %vm874_vm1, %v725_v18 }
  0x17   :  { %789 = vset.pattern.permute.xlu1 %v822_v58  ;;  %790 = vset.pattern.permute.xlu0 %v822_v58 }
  0x18   :  { %344 = vperm.xlu1 %789, %v900_v11   ;;  %348 = vperm.xlu0 %790, %v912_v14   ;;  %v340_v14 = vld [vmem:[%s1049_s3 + $0x8] sm:$0xff] }
  0x1c   :  { %352 = vperm.xlu1 %789, %v905_v12   ;;  %791 = vset.pattern.permute.xlu0 %v826_v19 }
  0x1d   :  { %730 = vmatpush3.bf16.xpose.msk.msra.mxu0 %vm874_vm1, %v725_v18  ;;  %v825_v18 = vmov 0.0   ;;  %462 = vperm.xlu0 %791, %v900_v11  }
  0x1e   :  { %733 = vmatprep.subr.msk.bf16.mxu0 %vm874_vm1, %v731_v21 }
  0x20   :  { %356 = vperm.xlu1 %789, %v917_v15   ;;  %v341_v15 = vld [vmem:[%s1049_s3 + $0x10] sm:$0xff] }
  0x25   :  { %736 = vmatpush3.bf16.xpose.msk.msra.mxu0 %vm874_vm1, %v731_v21 }
  0x26   :  { %739 = vmatprep.subr.msk.bf16.mxu0 %vm874_vm1, %v737_v24 }
  0x2d   :  { %742 = vmatpush3.bf16.xpose.msk.msra.mxu0 %vm874_vm1, %v737_v24 }
  0x2e   :  { %745 = vmatprep.subr.msk.bf16.mxu0 %vm874_vm1, %v743_v27 }
  0x35   :  { %748 = vmatpush3.bf16.xpose.msk.msra.mxu0 %vm874_vm1, %v743_v27 }
  0x36   :  { %751 = vmatprep.subr.msk.bf16.mxu0 %vm874_vm1, %v749_v30 }
  0x3d   :  { %754 = vmatpush3.bf16.xpose.msk.msra.mxu0 %vm874_vm1, %v749_v30 }
  0x44   :  { %663 = vmatmul.mubr.msk.f32.vlgmr.msra.gmra.mrb[0].mxu0 %vm68_vm0, %v29_v31 }
  0x45   :  { %665 = vmatprep.mubr.msk.f32.mxu0 %vm68_vm0, %v30_v32 }
  0x48   :  { %666 = vmatmul.mubr.msk.f32.gmra.mrb[2].mxu0 %vm68_vm0, %v31_v33 }
  0x83   :  { %v61_v37 = vpop.permute.xlu1 %60 }
  0x84   :  { %v51_v36 = vpop.permute.xlu0 %50 }
  0x87   :  { %v66_v45 = vpop.permute.xlu1 %65 }
  0x88   :  { %v56_v38 = vpop.permute.xlu0 %55 }
  0x8e   :  { %v224_v59 = vpop.permute.xlu0 %223  ;;  %v228_v60 = vpop.permute.xlu1 %227 }
  0x92   :  { %v236_v3 = vpop.permute.xlu0 %235  ;;  %v232_v5 = vpop.permute.xlu1 %231 }
  0x97   :  { %v345_v20 = vpop.permute.xlu1 %344  ;;  %v349_v22 = vpop.permute.xlu0 %348 }
  0x9b   :  { %v353_v21 = vpop.permute.xlu1 %352 }
  0x9f   :  { %v357_v28 = vpop.permute.xlu1 %356 }
 0x117   :  { %v664_v39 = vpop.f32.mrb[0].mxu0 }
 0x118   :  { %v201_v40 = vadd.f32 %v664_v39, %v56_v38  ;;  %v195_v41 = vpop.f32.mrb[1].mxu0  ;;  %v463_v38 = vpop.permute.xlu0 %462 }
 0x119   :  { %v196_v42 = vadd.f32 %v195_v41, %v51_v36 }
 0x11a   :  { %v215_v43 = vmax.f32 %v201_v40, 0.0 }
 0x11b   :  { %v214_v44 = vmax.f32 %v196_v42, 0.0  ;;  %v667_v46 = vpop.f32.mrb[2].mxu0 }
 0x11c   :  { %v211_v47 = vadd.f32 %v667_v46, %v66_v45  ;;  %v205_v48 = vpop.f32.mrb[3].mxu0 }
 0x11d   :  { %v206_v49 = vadd.f32 %v205_v48, %v61_v37  ;;  %v755_v50 = vpack.c.bf16 %v215_v43, %v214_v44  ;;  %v460_v37 = vld [vmem:[%s1050_s4] sm:$0x1] }
 0x11e   :  { %v217_v51 = vmax.f32 %v211_v47, 0.0 }
 0x11f   :  { %v216_v52 = vmax.f32 %v206_v49, 0.0  ;;  %756 = vmatprep.subr.bf16.mxu1 %v755_v50 }
 0x120   :  { %758 = vmatpush3.bf16.msra.mxu1 %v755_v50 }
 0x121   :  { %v759_v53 = vpack.c.bf16 %v217_v51, %v216_v52 }
 0x123   :  { %760 = vmatprep.subr.bf16.mxu1 %v759_v53 }
 0x124   :  { %762 = vmatpush3.bf16.msra.mxu1 %v759_v53 }
 0x127   :  { %677 = vmatmul.mubr.msk.f32.vlgmr.msra.gmra.mrb[0].mxu1 %vm68_vm0, %v219_v54 }
 0x128   :  { %679 = vmatprep.mubr.msk.f32.mxu1 %vm68_vm0, %v220_v55 }
 0x12b   :  { %680 = vmatmul.mubr.msk.f32.gmra.mrb[2].mxu1 %vm68_vm0, %v221_v56 }
 0x12c   :  { %690 = vmatprep.mubr.msk.f32.mxu1 %vm68_vm0, %v339_v57 }
 0x1fa   :  { %v678_v61 = vpop.f32.mrb[0].mxu1 }
 0x1fb   :  { %v322_v62 = vadd.f32 %v678_v61, %v228_v60  ;;  %v316_v63 = vpop.f32.mrb[1].mxu1 }
 0x1fc   :  { %v317_v0 = vadd.f32 %v316_v63, %v224_v59 }
 0x1fd   :  { %v336_v1 = vmax.f32 %v322_v62, 0.0 }
 0x1fe   :  { %v335_v2 = vmax.f32 %v317_v0, 0.0  ;;  %v681_v4 = vpop.f32.mrb[2].mxu1 }
 0x1ff   :  { %v332_v6 = vadd.f32 %v681_v4, %v236_v3  ;;  %v326_v7 = vpop.f32.mrb[3].mxu1 }
 0x200   :  { %v763_v8 = vpack.c.bf16 %v336_v1, %v335_v2  ;;  %v327_v9 = vadd.f32 %v326_v7, %v232_v5 }
 0x201   :  { %v338_v10 = vmax.f32 %v332_v6, 0.0 }
 0x202   :  { %v337_v13 = vmax.f32 %v327_v9, 0.0  ;;  %764 = vmatprep.subr.bf16.mxu1 %v763_v8 }
 0x203   :  { %766 = vmatpush3.bf16.msra.mxu1 %v763_v8 }
 0x204   :  { %v767_v12 = vpack.c.bf16 %v338_v10, %v337_v13 }
 0x206   :  { %768 = vmatprep.subr.bf16.mxu1 %v767_v12 }
 0x207   :  { %770 = vmatpush3.bf16.msra.mxu1 %v767_v12 }
 0x208   :  { %771 = vmatprep.subr.bf16.mxu1 %v823_v17 }
 0x20a   :  { %691 = vmatmul.mubr.msk.f32.vlgmr.msra.gmra.mrb[4].mxu1 %vm68_vm0, %v340_v14 }
 0x20b   :  { %693 = vmatprep.mubr.msk.f32.mxu1 %vm68_vm0, %v341_v15 }
 0x20e   :  { %694 = vmatmul.mubr.msk.f32.gmra.mrb[6].mxu1 %vm68_vm0, %v342_v16 }
 0x20f   :  { %704 = vmatprep.mubr.msk.f32.mxu1 %vm824_vm2, %v825_v18 }
 0x2dd   :  { %v692_v23 = vpop.f32.mrb[4].mxu1 }
 0x2de   :  { %v443_v24 = vadd.f32 %v692_v23, %v349_v22  ;;  %v437_v25 = vpop.f32.mrb[5].mxu1 }
 0x2df   :  { %v438_v26 = vadd.f32 %v437_v25, %v345_v20 }
 0x2e0   :  { %v457_v27 = vmax.f32 %v443_v24, 0.0 }
 0x2e1   :  { %v456_v29 = vmax.f32 %v438_v26, 0.0  ;;  %v695_v30 = vpop.f32.mrb[6].mxu1 }
 0x2e2   :  { %v453_v31 = vadd.f32 %v695_v30, %v357_v28  ;;  %v447_v32 = vpop.f32.mrb[7].mxu1 }
 0x2e3   :  { %v772_v33 = vpack.c.bf16 %v457_v27, %v456_v29  ;;  %v448_v34 = vadd.f32 %v447_v32, %v353_v21 }
 0x2e4   :  { %v459_v35 = vmax.f32 %v453_v31, 0.0 }
 0x2e5   :  { %v458_v36 = vmax.f32 %v448_v34, 0.0  ;;  %773 = vmatpush3.bf16.msra.mxu1 %v772_v33 }
 0x2e6   :  { %774 = vmatprep.subr.bf16.mxu1 %v823_v17 }
 0x2e7   :  { %v775_v11 = vpack.c.bf16 %v459_v35, %v458_v36 }
 0x2e9   :  { %776 = vmatpush3.bf16.msra.mxu1 %v775_v11 }
 0x2ec   :  { %705 = vmatmul.mubr.msk.f32.vlgmr.msra.gmra.mrb[8].mxu1 %vm68_vm0, %v460_v37 }
 0x3bf   :  { %v534_v39 = vpop.f32.mrb[8].mxu1 }
 0x3c0   :  { %v706_v40 = vpop.f32.mrb[9].mxu1  ;;  %v535_v41 = vadd.f32 %v534_v39, %v463_v38 }
 0x3c2   :  { %v588_v42 = vmul.f32 -1.442695, %v535_v41 }
 0x3c4   :  { %792 = vpow2.f32 %v588_v42 }
 0x3ce   :  { %v793_v43 = vpop.eup %792 }
 0x3cf   :  { %v541_v44 = vadd.f32 1.0, %v793_v43 }
 0x3d1   :  { %794 = vrcp.f32 %v541_v44 }
 0x3db   :  { %v795_v45 = vpop.eup %794 }
 0x3dc   :  { %544 = vst [vmem:[#allocation2] sm:$0x1] %v795_v45 }
 0x3dd   :  { %807 = shalt.err (!%p804_p4)
}
 0x3de   :  { %s808_s14 = scalar_lea.hbm %s1052_s6, 16 }
 0x3df   :  { %p809_p5 = scmp.ne.s32.totalorder %s1052_s6, %s808_s14  ;;  %p812_p6 = scmp.lt.u32.totalorder %s808_s14, %s1052_s6 }
 0x3e1   :  { %p814_p7 = pnand %p812_p6, %p809_p5 }
 0x3e3   :  { %817 = shalt.err (!%p814_p7)
}
 0x3e4   :  { %554 = dma.vmem_to_hbm [thread:$0]  %s552_s10, 16, %s1052_s6, [#allocation3]  }
 0x3e5   :  { %818 = dma.done.wait [#allocation3], 16  }
 0x3e6   :  { %819 = vsyncadd [#allocation3], 4294967280 }
 0x3e7   :  { %558 = vsyncpa [#allocation3], 1 }

</bundles_post_ra>
